<compile_context>
chip_gen: v6e
topology: v6e:2x2x1
jax: 0.10.0
libtpu: 0.0.40
codegen_flags: <defaults>
</compile_context>

<pallas_src>
import functools
import math

import jax
import jax.numpy as jnp
import numpy as np
from jax import lax
from jax.experimental import pallas as pl
from jax.experimental.pallas import tpu as pltpu


_NEG_INF = float(jnp.finfo(jnp.float32).min)


def _gelu(x):
    # tanh-approx GELU, matching the PyTorch module exactly (f32 math, tanh on EUP).
    return 0.5 * x * (1.0 + jnp.tanh(math.sqrt(2.0 / math.pi) * (x + 0.044715 * x ** 3)))


def _layernorm(x, gamma, beta, eps=1e-5):
    mu = jnp.mean(x, axis=-1, keepdims=True)
    var = jnp.mean((x - mu) ** 2, axis=-1, keepdims=True)
    return (x - mu) * lax.rsqrt(var + eps) * gamma + beta


# --------------------------------------------------------------------------------------
# fused FactBartEncoderLayer kernel
# --------------------------------------------------------------------------------------
def _encoder_layer_kernel(
        head_mask_ref,                       # SMEM (H,) f32
        x_ref,                               # VMEM (1, S, D)
        mask_ref,                            # VMEM (1, 1, S) f32 additive key mask
        wqg_ref, bqg_ref,                    # VMEM (G, D, gw) cdt / (G, 1, gw) f32
        wkg_ref, bkg_ref,
        wvg_ref, bvg_ref,
        wog_ref, bo_ref,                     # VMEM (G, gw, D) cdt / (1, D) f32
        g1_ref, be1_ref,                     # VMEM (1, D) f32
        w1_ref, b1_ref,                      # VMEM (D, F) cdt / (1, F) f32
        w2_ref, b2_ref,                      # VMEM (F, D) cdt / (1, D) f32
        g2_ref, be2_ref,                     # VMEM (1, D) f32
        out_ref,                             # VMEM (1, tq, D)
        k_scr, v_scr,                        # VMEM (G, S, gw) cdt  per-batch K/V cache
        mask_scr,                            # VMEM (tq, S) f32     pre-broadcast key mask
        acc_scr,                             # VMEM (tq, D) f32     out-proj accumulator
        *, heads_per_group, head_dim, compute_dtype, approx_recip, recompute_kv):
    S = x_ref.shape[1]
    tq = out_ref.shape[1]
    n_groups = k_scr.shape[0]
    cdt = compute_dtype
    q_idx = pl.program_id(1)
    row0 = pl.multiple_of(q_idx * tq, tq)

    # ---- per-batch prologue: group-major K/V projection cache + pre-broadcast mask ----
    def _fill_kv_and_mask():
        mask_scr[...] = jnp.broadcast_to(mask_ref[0], (tq, S))

        def body(g, carry):
            xb = x_ref[0].astype(cdt)                                          # (S, D)
            k_scr[g] = (jnp.dot(xb, wkg_ref[g], preferred_element_type=jnp.float32)
                        + bkg_ref[g]).astype(cdt)
            v_scr[g] = (jnp.dot(xb, wvg_ref[g], preferred_element_type=jnp.float32)
                        + bvg_ref[g]).astype(cdt)
            return carry

        lax.fori_loop(0, n_groups, body, 0)

    if recompute_kv:
        _fill_kv_and_mask()                  # per-tile K/V (lets query tiles run on both TCs)
    else:
        pl.when(q_idx == 0)(_fill_kv_and_mask)

    # ---- attention: fori_loop over head groups; all K/V-cache accesses, Q projections and
    #      accumulator stores are full gw(=128)-lane blocks; per-head slicing happens on
    #      small in-register values only -------------------------------------------------
    acc_scr[...] = jnp.zeros_like(acc_scr)

    def group_body(g, carry):
        x_q = x_ref[0, pl.ds(row0, tq), :].astype(cdt)                         # (tq, D)
        q_g = (jnp.dot(x_q, wqg_ref[g], preferred_element_type=jnp.float32)
               + bqg_ref[g]).astype(cdt)                                       # (tq, gw)
        k_g = k_scr[g]                                                         # (S, gw)
        v_g = v_scr[g]                                                         # (S, gw)

        head_outs = []
        for i in range(heads_per_group):
            lo = i * head_dim
            qh = q_g[:, lo:lo + head_dim]
            kh = k_g[:, lo:lo + head_dim]
            vh = v_g[:, lo:lo + head_dim]
            # NOTE: this BART variant does NOT scale scores by 1/sqrt(head_dim).
            s = lax.dot_general(qh, kh, (((1,), (1,)), ((), ())),
                                preferred_element_type=jnp.float32)            # (tq, S)
            s = s + mask_scr[...]
            s = s - jnp.max(s, axis=-1, keepdims=True)
            e = jnp.exp(s)
            inv = pl.reciprocal(jnp.sum(e, axis=-1, keepdims=True), approx=approx_recip)
            p = e * inv                                                        # f32 softmax
            h_out = jnp.dot(p.astype(cdt), vh, preferred_element_type=jnp.float32)
            # layer_head_mask applied to the (tq, hd) head output (== masking the probs)
            h_out = h_out * head_mask_ref[g * heads_per_group + i]
            head_outs.append(h_out.astype(cdt))

        group_out = head_outs[0] if heads_per_group == 1 else jnp.concatenate(head_outs, -1)
        acc_scr[...] += jnp.dot(group_out, wog_ref[g],
                                preferred_element_type=jnp.float32)            # (tq, D) f32
        return carry

    lax.fori_loop(0, n_groups, group_body, 0)

    # ---- output projection bias + residual + LayerNorm (f32) ----
    x_q32 = x_ref[0, pl.ds(row0, tq), :].astype(jnp.float32)                   # residual rows
    attn = acc_scr[...] + bo_ref[...]
    h1 = _layernorm(attn + x_q32, g1_ref[...], be1_ref[...])

    # ---- FFN (tanh-GELU) + residual + LayerNorm (f32 elementwise, cdt matmul inputs) ----
    ff = jnp.dot(h1.astype(cdt), w1_ref[...], preferred_element_type=jnp.float32) + b1_ref[...]
    ff = _gelu(ff)
    ff = jnp.dot(ff.astype(cdt), w2_ref[...], preferred_element_type=jnp.float32) + b2_ref[...]
    out = _layernorm(ff + h1, g2_ref[...], be2_ref[...])

    out_ref[0] = out.astype(out_ref.dtype)                                     # lane-dense store


def _device_kind():
    try:
        return jax.devices()[0].device_kind.lower()
    except Exception:  # pragma: no cover
        return ""


def _default_q_block():
    kind = _device_kind()
    # v5e: 128x128 MXU tiles -> tq=128 halves the softmax/FFN live set at no MXU cost.
    if "v5e" in kind or "v5 lite" in kind or "v5lite" in kind:
        return 128
    return 256  # v6e / v7x: 256-wide MXU


def _heads_per_group(num_heads, head_dim):
    if head_dim >= 128 or 128 % head_dim != 0:
        return 1
    hpg = min(num_heads, 128 // head_dim)
    while num_heads % hpg != 0:
        hpg -= 1
    return max(hpg, 1)


def fact_bart_encoder_layer(hidden_states, attention_mask_rows, layer_head_mask, params, *,
                            num_heads, q_block=None, compute_dtype=jnp.bfloat16,
                            approx_softmax_recip=True, vmem_limit_bytes=None,
                            split_queries_across_cores=None):
    """One FactBartEncoderLayer forward pass (inference) as a fused Pallas kernel."""
    B, S, D = hidden_states.shape
    assert D % num_heads == 0
    head_dim = D // num_heads
    cdt = compute_dtype
    F = params["w1"].shape[1]

    # query tile: must divide S and be sublane friendly; generation-aware default
    if q_block is None:
        q_block = _default_q_block()
    if q_block >= S or S % q_block != 0 or q_block % 8 != 0:
        tq = S
    else:
        tq = q_block
    n_q = S // tq

    hpg = _heads_per_group(num_heads, head_dim)   # heads per 128-lane group
    gw = hpg * head_dim                           # group lane width (128 for hd=64)
    G = num_heads // hpg

    # v7x has 2 TensorCores; with B == 1 the batch ("parallel") axis cannot use both,
    # so recompute K/V per query tile and mark the query axis parallel as well.
    if split_queries_across_cores is None:
        split_queries_across_cores = ("v7" in _device_kind()) and B == 1 and n_q > 1
    recompute_kv = bool(split_queries_across_cores)

    # ---- boundary-time weight prep: head-group-major layouts, bf16 matmul inputs ----
    def group_cols(w):      # (D, D) -> (G, D, gw)
        return w.reshape(D, G, gw).transpose(1, 0, 2).astype(cdt)

    def group_bias(b):      # (1, D) or (D,) -> (G, 1, gw) f32
        return b.reshape(G, 1, gw).astype(jnp.float32)

    wqg, wkg, wvg = (group_cols(params[k]) for k in ("wq", "wk", "wv"))
    bqg, bkg, bvg = (group_bias(params[k]) for k in ("bq", "bk", "bv"))
    wog = params["wo"].reshape(G, gw, D).astype(cdt)
    w1 = params["w1"].astype(cdt)
    w2 = params["w2"].astype(cdt)
    bo, b1, b2 = (params[k].reshape(1, -1).astype(jnp.float32) for k in ("bo", "b1", "b2"))
    g1, be1, g2, be2 = (params[k].reshape(1, -1).astype(jnp.float32)
                        for k in ("g1", "be1", "g2", "be2"))

    weights = (wqg, bqg, wkg, bkg, wvg, bvg, wog, bo, g1, be1, w1, b1, w2, b2, g2, be2)
    mask3 = attention_mask_rows.reshape(B, 1, S).astype(jnp.float32)

    # ---- explicit VMEM budget (weights are single-buffered whole-array VMEM operands) ----
    if vmem_limit_bytes is None:
        itemsize = hidden_states.dtype.itemsize
        cbytes = jnp.dtype(cdt).itemsize
        est = 0
        est += 2 * S * D * itemsize                         # double-buffered x block
        est += 2 * S * 4                                    # mask block
        est += 2 * tq * D * itemsize                        # out block
        est += sum(int(np.prod(w.shape)) * w.dtype.itemsize for w in weights)
        est += 2 * G * S * gw * cbytes                      # K/V cache scratch
        est += tq * S * 4 + tq * D * 4                      # mask_scr + acc_scr
        est += 2 * tq * S * 4 + 2 * tq * F * 4              # softmax / FFN intermediates headroom
        vmem_limit_bytes = int(min(max(int(est * 1.25), 32 * 1024 * 1024), 64 * 1024 * 1024))

    kernel = functools.partial(
        _encoder_layer_kernel,
        heads_per_group=hpg, head_dim=head_dim, compute_dtype=cdt,
        approx_recip=approx_softmax_recip, recompute_kv=recompute_kv)

    # Whole-array VMEM operands: weights live in a single VMEM copy (no double buffering).
    vmem_whole = pl.BlockSpec(memory_space=pltpu.MemorySpace.VMEM)
    in_specs = [
        pl.BlockSpec(memory_space=pltpu.MemorySpace.SMEM),          # layer_head_mask (H,)
        pl.BlockSpec((1, S, D), lambda b, q: (b, 0, 0)),            # hidden_states (full S rows)
        pl.BlockSpec((1, 1, S), lambda b, q: (b, 0, 0)),            # additive key-mask row
    ] + [vmem_whole] * len(weights)

    # q axis must be "arbitrary" when the per-batch K/V cache in scratch is filled at q==0
    # and reused; with recompute_kv it becomes independent and can go parallel too.
    dim_sem = ("parallel", "parallel") if recompute_kv else ("parallel", "arbitrary")

    fn = pl.pallas_call(
        kernel,
        out_shape=jax.ShapeDtypeStruct((B, S, D), hidden_states.dtype),
        grid=(B, n_q),
        in_specs=in_specs,
        out_specs=pl.BlockSpec((1, tq, D), lambda b, q: (b, q, 0)),
        scratch_shapes=[
            pltpu.VMEM((G, S, gw), cdt),        # K cache (head-group major)
            pltpu.VMEM((G, S, gw), cdt),        # V cache
            pltpu.VMEM((tq, S), jnp.float32),   # pre-broadcast additive key mask
            pltpu.VMEM((tq, D), jnp.float32),   # attention out-proj accumulator
        ],
        compiler_params=pltpu.CompilerParams(
            dimension_semantics=dim_sem,
            vmem_limit_bytes=vmem_limit_bytes),
    )
    return fn(layer_head_mask.astype(jnp.float32), hidden_states, mask3, *weights)


# --------------------------------------------------------------------------------------
# embedding sum + embedding LayerNorm kernel
# --------------------------------------------------------------------------------------
def _embed_ln_kernel(tok_ref, pos_ref, g_ref, b_ref, out_ref):
    x = tok_ref[0].astype(jnp.float32) + pos_ref[...].astype(jnp.float32)
    out_ref[0] = _layernorm(x, g_ref[...], b_ref[...]).astype(out_ref.dtype)


def _embed_layernorm(tok_embeds, pos_embeds, gamma, beta):
    B, S, D = tok_embeds.shape
    return pl.pallas_call(
        _embed_ln_kernel,
        out_shape=jax.ShapeDtypeStruct((B, S, D), jnp.float32),
        grid=(B,),
        in_specs=[pl.BlockSpec((1, S, D), lambda b: (b, 0, 0)),
                  pl.BlockSpec((S, D), lambda b: (0, 0)),
                  pl.BlockSpec((1, D), lambda b: (0, 0)),
                  pl.BlockSpec((1, D), lambda b: (0, 0))],
        out_specs=pl.BlockSpec((1, S, D), lambda b: (b, 0, 0)),
        compiler_params=pltpu.CompilerParams(dimension_semantics=("parallel",)),
    )(tok_embeds, pos_embeds, gamma.reshape(1, D), beta.reshape(1, D))


# --------------------------------------------------------------------------------------
# full FactBartEncoder forward (inference)
# --------------------------------------------------------------------------------------
def fact_bart_encoder(input_ids, attention_mask, head_mask, params, *, num_heads, **layer_kwargs):
    """FactBartEncoder forward pass (inference): embeddings + N fused encoder layers.

    input_ids      : [B, S] int32
    attention_mask : [B, S] with 1 = keep, 0 = pad (or None)
    head_mask      : [num_layers, H] (or None)
    """
    B, S = input_ids.shape
    # TODO(synk): the token-embedding gather stays in plain JAX (data-dependent vocab gather;
    # a manual-DMA Pallas gather buys nothing here).
    tok = jnp.take(params["embed_tokens"], input_ids, axis=0)                 # (B, S, D)
    pos = params["pos_embed"][:S]                                             # (S, D)
    h = _embed_layernorm(tok, pos, params["emb_ln_g"], params["emb_ln_b"])
    # dropout / layerdrop: identity at inference

    if attention_mask is None:
        mask_rows = jnp.zeros((B, S), jnp.float32)
    else:
        # compact form of _expand_mask: (1 - mask) * finfo(f32).min, constant along query axis
        mask_rows = (1.0 - attention_mask.astype(jnp.float32)) * _NEG_INF

    n_layers = len(params["layers"])
    if head_mask is None:
        head_mask = jnp.ones((n_layers, num_heads), jnp.float32)

    for idx, lp in enumerate(params["layers"]):
        h = fact_bart_encoder_layer(h, mask_rows, head_mask[idx], lp,
                                    num_heads=num_heads, **layer_kwargs)
    return h


# --------------------------------------------------------------------------------------
# pure-JAX reference (correctness check)
# --------------------------------------------------------------------------------------
def _ref_ln(t, g, b, eps=1e-5):
    mu = t.mean(-1, keepdims=True)
    var = ((t - mu) ** 2).mean(-1, keepdims=True)
    return (t - mu) / jnp.sqrt(var + eps) * g + b


def _reference_layer(x, mask_rows, head_mask, p, num_heads):
    B, S, D = x.shape
    hd = D // num_heads

    def split(t):
        return t.reshape(B, S, num_heads, hd).transpose(0, 2, 1, 3)

    q = split(x @ p["wq"] + p["bq"])
    k = split(x @ p["wk"] + p["bk"])
    v = split(x @ p["wv"] + p["bv"])
    s = jnp.einsum("bhqd,bhkd->bhqk", q, k) + mask_rows[:, None, None, :]
    probs = jax.nn.softmax(s, axis=-1) * head_mask[None, :, None, None]
    attn = jnp.einsum("bhqk,bhkd->bhqd", probs, v).transpose(0, 2, 1, 3).reshape(B, S, D)
    attn = attn @ p["wo"] + p["bo"]
    h1 = _ref_ln(attn + x, p["g1"], p["be1"])
    ff = h1 @ p["w1"] + p["b1"]
    ff = 0.5 * ff * (1 + jnp.tanh(math.sqrt(2 / math.pi) * (ff + 0.044715 * ff ** 3)))
    ff = ff @ p["w2"] + p["b2"]
    return _ref_ln(ff + h1, p["g2"], p["be2"])


def _reference_encoder(input_ids, attention_mask, head_mask, params, num_heads):
    S = input_ids.shape[1]
    x = jnp.take(params["embed_tokens"], input_ids, axis=0) + params["pos_embed"][:S][None]
    x = _ref_ln(x, params["emb_ln_g"], params["emb_ln_b"])
    mask_rows = (1.0 - attention_mask.astype(jnp.float32)) * _NEG_INF
    for idx, lp in enumerate(params["layers"]):
        x = _reference_layer(x, mask_rows, head_mask[idx], lp, num_heads)
    return x


if __name__ == "__main__":
    B, S, D, H, F = 2, 16, 32, 4, 64
    VOCAB, MAX_POS, N_LAYERS = 50, 32, 2

    key = jax.random.PRNGKey(0)

    def w(k, shape, scale=0.05):
        return (scale * jax.random.normal(k, shape)).astype(jnp.float32)

    def make_layer(k):
        ks = jax.random.split(k, 16)
        return {
            "wq": w(ks[0], (D, D)), "bq": w(ks[1], (1, D)),
            "wk": w(ks[2], (D, D)), "bk": w(ks[3], (1, D)),
            "wv": w(ks[4], (D, D)), "bv": w(ks[5], (1, D)),
            "wo": w(ks[6], (D, D)), "bo": w(ks[7], (1, D)),
            "g1": jnp.ones((1, D), jnp.float32) + w(ks[8], (1, D)), "be1": w(ks[9], (1, D)),
            "w1": w(ks[10], (D, F)), "b1": w(ks[11], (1, F)),
            "w2": w(ks[12], (F, D)), "b2": w(ks[13], (1, D)),
            "g2": jnp.ones((1, D), jnp.float32) + w(ks[14], (1, D)), "be2": w(ks[15], (1, D)),
        }

    k_emb, k_pos, k_ln, k_lay, k_ids, k_hm = jax.random.split(key, 6)
    params = {
        "embed_tokens": w(k_emb, (VOCAB, D), scale=0.5),
        "pos_embed": w(k_pos, (MAX_POS, D), scale=0.5),
        "emb_ln_g": jnp.ones((D,), jnp.float32) + w(k_ln, (D,)),
        "emb_ln_b": w(jax.random.fold_in(k_ln, 1), (D,)),
        "layers": [make_layer(kk) for kk in jax.random.split(k_lay, N_LAYERS)],
    }

    input_ids = jax.random.randint(k_ids, (B, S), 0, VOCAB, dtype=jnp.int32)
    # key-padding mask: batch 1 pads out the last 3 positions
    key_pos = jnp.arange(S)[None, :]
    attention_mask = jnp.where((key_pos >= S - 3) & (jnp.arange(B)[:, None] == 1),
                               0.0, 1.0).astype(jnp.float32)
    head_mask = (1.0 + 0.25 * jax.random.normal(k_hm, (N_LAYERS, H))).astype(jnp.float32)

    ref = _reference_encoder(input_ids, attention_mask, head_mask, params, H)

    # strict f32 path: exact reciprocal, two query tiles per batch (exercises K/V cache reuse)
    out_f32 = fact_bart_encoder(
        input_ids, attention_mask, head_mask, params, num_heads=H,
        q_block=8, compute_dtype=jnp.float32, approx_softmax_recip=False)
    out_f32 = jax.block_until_ready(out_f32)
    np.testing.assert_allclose(np.asarray(out_f32), np.asarray(ref), rtol=5e-4, atol=5e-4)

    # default production path: bf16 MXU inputs, f32 accumulation / softmax / LayerNorm
    out_bf16 = fact_bart_encoder(
        input_ids, attention_mask, head_mask, params, num_heads=H, q_block=8)
    out_bf16 = jax.block_until_ready(out_bf16)
    np.testing.assert_allclose(np.asarray(out_bf16), np.asarray(ref), rtol=1e-1, atol=1e-1)

    print("KERNEL_OK")
</pallas_src>

<mosaic_0001>
module attributes {stable_mosaic.version = 11 : i64} {
  func.func @_embed_ln_kernel(%arg0: i32, %arg1: memref<1x16x32xf32, #tpu.memory_space<vmem>>, %arg2: memref<16x32xf32, #tpu.memory_space<vmem>>, %arg3: memref<1x32xf32, #tpu.memory_space<vmem>>, %arg4: memref<1x32xf32, #tpu.memory_space<vmem>>, %arg5: memref<1x16x32xf32, #tpu.memory_space<vmem>>) attributes {dimension_semantics = [#tpu.dimension_semantics<parallel>], iteration_bounds = array<i64: 2>, scalar_prefetch = 0 : i64, scratch_operands = 0 : i64, tpu.core_type = #tpu.core_type<tc>, window_params = [{transform_indices = @transform_0, window_bounds = array<i64: 1, 16, 32>}, {pipeline_mode = #tpu.pipeline_mode<synchronous>, transform_indices = @transform_1, window_bounds = array<i64: 16, 32>}, {pipeline_mode = #tpu.pipeline_mode<synchronous>, transform_indices = @transform_2, window_bounds = array<i64: 1, 32>}, {pipeline_mode = #tpu.pipeline_mode<synchronous>, transform_indices = @transform_3, window_bounds = array<i64: 1, 32>}, {transform_indices = @transform_4, window_bounds = array<i64: 1, 16, 32>}]} {
    %c0 = arith.constant 0 : index
    %c0_0 = arith.constant 0 : index
    %c0_1 = arith.constant 0 : index
    %0 = vector.load %arg1[%c0, %c0_0, %c0_1] : memref<1x16x32xf32, #tpu.memory_space<vmem>>, vector<1x16x32xf32>
    %1 = vector.shape_cast %0 : vector<1x16x32xf32> to vector<16x32xf32>
    %c0_2 = arith.constant 0 : index
    %c0_3 = arith.constant 0 : index
    %2 = vector.load %arg2[%c0_2, %c0_3] : memref<16x32xf32, #tpu.memory_space<vmem>>, vector<16x32xf32>
    %3 = arith.addf %1, %2 : vector<16x32xf32>
    %c0_4 = arith.constant 0 : index
    %c0_5 = arith.constant 0 : index
    %4 = vector.load %arg3[%c0_4, %c0_5] : memref<1x32xf32, #tpu.memory_space<vmem>>, vector<1x32xf32>
    %c0_6 = arith.constant 0 : index
    %c0_7 = arith.constant 0 : index
    %5 = vector.load %arg4[%c0_6, %c0_7] : memref<1x32xf32, #tpu.memory_space<vmem>>, vector<1x32xf32>
    %cst = arith.constant dense<0.000000e+00> : vector<16xf32>
    %6 = vector.multi_reduction <add>, %3, %cst [1] : vector<16x32xf32> to vector<16xf32>
    %7 = vector.shape_cast %6 : vector<16xf32> to vector<16x1xf32>
    %cst_8 = arith.constant 3.200000e+01 : f32
    %8 = vector.broadcast %cst_8 : f32 to vector<16x1xf32>
    %9 = arith.divf %7, %8 : vector<16x1xf32>
    %10 = vector.broadcast %9 : vector<16x1xf32> to vector<16x32xf32>
    %11 = arith.subf %3, %10 : vector<16x32xf32>
    %12 = arith.mulf %11, %11 : vector<16x32xf32>
    %cst_9 = arith.constant dense<0.000000e+00> : vector<16xf32>
    %13 = vector.multi_reduction <add>, %12, %cst_9 [1] : vector<16x32xf32> to vector<16xf32>
    %14 = vector.shape_cast %13 : vector<16xf32> to vector<16x1xf32>
    %cst_10 = arith.constant 3.200000e+01 : f32
    %15 = vector.broadcast %cst_10 : f32 to vector<16x1xf32>
    %16 = arith.divf %14, %15 : vector<16x1xf32>
    %17 = vector.broadcast %9 : vector<16x1xf32> to vector<16x32xf32>
    %18 = arith.subf %3, %17 : vector<16x32xf32>
    %cst_11 = arith.constant 9.99999974E-6 : f32
    %19 = vector.broadcast %cst_11 : f32 to vector<16x1xf32>
    %20 = arith.addf %16, %19 : vector<16x1xf32>
    %21 = math.rsqrt %20 : vector<16x1xf32>
    %22 = vector.broadcast %21 : vector<16x1xf32> to vector<16x32xf32>
    %23 = arith.mulf %18, %22 : vector<16x32xf32>
    %24 = vector.broadcast %4 : vector<1x32xf32> to vector<16x32xf32>
    %25 = arith.mulf %23, %24 : vector<16x32xf32>
    %26 = vector.broadcast %5 : vector<1x32xf32> to vector<16x32xf32>
    %27 = arith.addf %25, %26 : vector<16x32xf32>
    %c0_12 = arith.constant 0 : index
    %c0_13 = arith.constant 0 : index
    %c0_14 = arith.constant 0 : index
    %28 = vector.load %arg5[%c0_12, %c0_13, %c0_14] : memref<1x16x32xf32, #tpu.memory_space<vmem>>, vector<1x16x32xf32>
    %29 = vector.shape_cast %28 : vector<1x16x32xf32> to vector<16x32xf32>
    %30 = vector.shape_cast %27 : vector<16x32xf32> to vector<1x16x32xf32>
    tpu.vector_store %arg5[%c0_12, %c0_13, %c0_14], %30 {strides = array<i32>} : memref<1x16x32xf32, #tpu.memory_space<vmem>>, vector<1x16x32xf32>,
    return
  }
  func.func @transform_0(%arg0: i32) -> (i32, i32, i32) {
    %c0_i32 = arith.constant 0 : i32
    %c0_i32_0 = arith.constant 0 : i32
    %c0_i32_1 = arith.constant 0 : i32
    return %arg0, %c0_i32, %c0_i32_0 : i32, i32, i32
  }
  func.func @transform_1(%arg0: i32) -> (i32, i32) {
    %c0_i32 = arith.constant 0 : i32
    %c0_i32_0 = arith.constant 0 : i32
    %c0_i32_1 = arith.constant 0 : i32
    return %c0_i32, %c0_i32_0 : i32, i32
  }
  func.func @transform_2(%arg0: i32) -> (i32, i32) {
    %c0_i32 = arith.constant 0 : i32
    %c0_i32_0 = arith.constant 0 : i32
    %c0_i32_1 = arith.constant 0 : i32
    return %c0_i32, %c0_i32_0 : i32, i32
  }
  func.func @transform_3(%arg0: i32) -> (i32, i32) {
    %c0_i32 = arith.constant 0 : i32
    %c0_i32_0 = arith.constant 0 : i32
    %c0_i32_1 = arith.constant 0 : i32
    return %c0_i32, %c0_i32_0 : i32, i32
  }
  func.func @transform_4(%arg0: i32) -> (i32, i32, i32) {
    %c0_i32 = arith.constant 0 : i32
    %c0_i32_0 = arith.constant 0 : i32
    %c0_i32_1 = arith.constant 0 : i32
    return %arg0, %c0_i32, %c0_i32_0 : i32, i32, i32
  }
}

</mosaic_0001>

<bundles_post_ra>
// kernel: tpu_custom_call.1
= control target key start
LH: loop header
LB: loop body
LE: loop exit
PB: predicated region body
PF: predicated region fallthrough
CT: control target
= control target key end

     0   :  { %9 = vsyncpa [#allocation3], 0  ;;  %s822_s0 = inlined_call_operand.hbm [shape: f32[2,16,32], index: 0, kind: input, shape index: {}]   ;;  %s823_s1 = inlined_call_operand.hbm [shape: f32[16,32], index: 1, kind: input, shape index: {}]   ;;  %s824_s2 = inlined_call_operand.vmem [shape: f32[1,32], index: 2, kind: input, shape index: {}]   ;;  %s825_s3 = inlined_call_operand.vmem [shape: f32[1,32], index: 3, kind: input, shape index: {}]   ;;  %s826_s4 = inlined_call_operand.hbm [shape: f32[2,16,32], index: 4, kind: output, shape index: {}]  }
   0x1   :  { %11 = vsyncpa [#allocation3 + $0x1], 0 }
   0x2   :  { %12 = vsyncpa [#allocation6], 0 }
   0x3   :  { %13 = vsyncpa [#allocation4], 0 }
   0x4   :  { %15 = vsyncpa [#allocation4 + $0x1], 0  ;;  %s623_s15 = smov 0   ;;  %s625_s16 = smov 0  }
   0x5   :  { %s627_s17 = smov 0   ;;  %s629_s18 = smov 0  }
   0x6 LB: > { %s644_s19 = sadd.s32 4294967295, %s589_s18   ;;  %s382_s20 = sadd.s32 4294967294, %s589_s18   ;;  %s589_s18 = sphi %s629_s18, %s848_s18   ;;  %s585_s17 = sphi %s627_s17, %s847_s17   ;;  %s581_s16 = sphi %s625_s16, %s846_s16   ;;  %s577_s15 = sphi %s623_s15, %s845_s15  }
   0x7   : > { %p41_p0 = scmp.ne.s32.totalorder %s581_s16, %s577_s15  ;;  %p827_p1 = scmp.eq.s32.totalorder %s644_s19, 0 }
   0x8   : > { %p134_p3 = scmp.eq.s32.totalorder %s382_s20, 1  ;;  %p383_p5 = scmp.ge.s32.totalorder %s589_s18, 1 }
   0x9   : > { %p653_p4 = por %p827_p1, %p41_p0  ;;  %p141_p7 = scmp.lt.s32.totalorder %s589_s18, 3 }
   0xa   : > { %p658_p6 = por %p134_p3, %p41_p0  ;;  %s591_s24 = smov [#allocation5]  }
   0xb   : > { %s831_s21 = scalar_select %p653_p4, 1, 0 }
   0xc   : > { %s832_s22 = scalar_select %p658_p6, 1, 0 }
   0xd   : > { %p663_p8 = pnand %p383_p5, %p141_p7  ;;  %s153_s25 = sshll.u32 %s591_s24, 4  ;;  %s154_s25 = int_to_ptr.vmem [resolvable:$true] %s153_s25 }
   0xe   : > { %s677_s27 = sadd.s32 1, %s589_s18   ;;  %s28_s28 = sadd.s32 1, %s585_s17 }
   0xf   : > { %s833_s23 = scalar_select %p663_p8, 1, 0 }
  0x10   : > { %p410_p9 = pneg %p663_p8  ;;  %s25_s29 = ssub.s32 %s589_s18, %s677_s27 }
  0x11   : > { %s478_s30 = scalar_lea.vmem %s154_s25, 256  ;;  %p486_p5 = scmp.lt.s32.totalorder %s154_s25, %s154_s25 }
  0x12   : > { %p672_p11 = pnand %p410_p9, %p827_p1  ;;  %p479_p13 = scmp.ne.s32.totalorder %s154_s25, %s478_s30 }
  0x13   : > { %p487_p7 = scmp.lt.s32.totalorder %s478_s30, %s478_s30 }
  0x14   : > { %p469_p12 = pneg %p672_p11 }
  0x15   : > { %p488_p10 = por %p487_p7, %p486_p5 }
  0x16   : > { %p481_p0 = pnand %p479_p13, %p469_p12 }
  0x18   : > { %p482_p3 = pneg %p481_p0 }
  0x1a   : > { %p489_p2 = pnand %p488_p10, %p482_p3 }
  0x1c   : > { %492 = shalt.err (!%p489_p2)
}
  0x1d   : > { %s592_s5 = smov 128   ;;  %s593_s6 = smov 8  }
  0x1e   : > { %413 = dma.hbm_to_vmem [thread:$0]  (!%p672_p11), %s823_s1, 256, %s154_s25, [#allocation6], %s592_s5, %s592_s5, %s593_s6  }
  0x1f   : > { %p26_p2 = scmp.eq.s32.totalorder %s25_s29, 0  ;;  %p35_p9 = scmp.ne.s32.totalorder %s585_s17, %s581_s16 }
  0x20   : > { %p36_p10 = scmp.eq.s32.totalorder %s589_s18, 0  ;;  %p423_p12 = scmp.lt.s32.totalorder %s589_s18, 2 }
  0x21   : > { %s697_s9 = scalar_select %p26_p2, %s585_s17, %s28_s28  }
  0x22   : > { %p37_p13 = por %p36_p10, %p35_p9  ;;  %p835_p0 = scmp.eq.s32.totalorder %s644_s19, 1 }
  0x23   : > { %s173_s11 = sand.u32 1, %s585_s17   ;;  %s400_s12 = sshll.u32 %s589_s18, 8 }
  0x24   : > { %p701_p3 = por %p835_p0, %p35_p9  ;;  %s386_s13 = sshll.u32 %s173_s11, 4 }
  0x25   : > { %s710_s24 = scalar_lea.hbm %s822_s0, %s400_s12  ;;  %s177_s25 = scalar_lea.vmem [#allocation2], %s386_s13 }
  0x26   : > { %s836_s10 = scalar_select %p701_p3, 1, 0 }
  0x27   : > { %s184_s26 = sshll.u32 %s177_s25, 4  ;;  %p712_p11 = pnand %p423_p12, %p37_p13  ;;  %s716_s26 = int_to_ptr.vmem [resolvable:$true] %s184_s26 }
  0x28   : > { %s718_s29 = scalar_lea.sflag [#allocation3], %s173_s11  ;;  %s493_s30 = scalar_lea.hbm %s710_s24, 256 }
  0x29   : > { %p494_p5 = scmp.ne.s32.totalorder %s710_s24, %s493_s30  ;;  %p495_p7 = pneg %p712_p11 }
  0x2a   : > { %s498_s12 = scalar_lea.hbm %s822_s0, 512  ;;  %p499_p10 = scmp.lt.s32.totalorder %s710_s24, %s822_s0 }
  0x2b   : > { %p496_p2 = pnand %p495_p7, %p494_p5  ;;  %p500_p12 = scmp.lt.s32.totalorder %s498_s12, %s493_s30 }
  0x2d   : > { %p497_p9 = pneg %p496_p2  ;;  %p501_p13 = por %p500_p12, %p499_p10 }
  0x2f   : > { %p502_p0 = pnand %p501_p13, %p497_p9 }
  0x31   : > { %505 = shalt.err (!%p502_p0)
}
  0x32   : > { %s506_s11 = scalar_lea.vmem %s716_s26, 256  ;;  %s594_s20 = smov [#allocation2]  }
  0x33   : > { %p507_p1 = scmp.ne.s32.totalorder %s716_s26, %s506_s11  ;;  %s511_s25 = sshll.u32 %s594_s20, 4  ;;  %s512_s25 = int_to_ptr.vmem [resolvable:$false] %s511_s25 }
  0x34   : > { %s513_s7 = scalar_lea.vmem %s512_s25, 512  ;;  %p514_p2 = scmp.lt.s32.totalorder %s716_s26, %s512_s25 }
  0x35   : > { %p509_p6 = pnand %p507_p1, %p495_p7  ;;  %p515_p3 = scmp.lt.s32.totalorder %s513_s7, %s506_s11 }
  0x37   : > { %p510_p5 = pneg %p509_p6  ;;  %p516_p4 = por %p515_p3, %p514_p2 }
  0x39   : > { %p517_p8 = pnand %p516_p4, %p510_p5 }
  0x3b   : > { %520 = shalt.err (!%p517_p8)
}
  0x3c   : > { %417 = dma.hbm_to_vmem [thread:$0]  (!%p712_p11), %s710_s24, 256, %s716_s26, %s718_s29, %s592_s5, %s592_s5, %s593_s6  }
  0x3d   : > { %p838_p1 = scmp.ne.s32.totalorder %s833_s23, 0 }
  0x3e   : > { %s745_s30 = sand.u32 (!%p838_p1), 1, %s581_s16   ;;  %p839_p4 = scmp.ne.s32.totalorder (!%p838_p1), %s831_s21, 0 }
  0x3f   : > { %196 = sbr.rel (%p838_p1) target bundleno = 402 (0x192), region = 36  ;;  %s390_s8 = sshll.u32 (!%p838_p1), %s745_s30, 4 }
  0x40   : > { %s199_s12 = scalar_lea.sflag (!%p838_p1), [#allocation3], %s745_s30  ;;  %s202_s28 = scalar_lea.vmem (!%p838_p1), [#allocation2], %s390_s8 }
  0x44   : > { %564 = dma.done.wait (%p839_p4), %s199_s12, 256  }
  0x45   : > { %566 = vsyncadd (%p839_p4), %s199_s12, 4294967040  ;;  %p840_p6 = scmp.eq.s32.totalorder %s644_s19, 0 }
  0x47   : > { %568 = dma.done.wait (%p840_p6), [#allocation6], 256   ;;  %p841_p8 = pmov %p840_p6 }
  0x48   : > { %v231_v0 = vld [vmem:[%s202_s28] sm:$0xff]  ;;  %vm239_vm0 = vcmask 261120   ;;  %v232_v2 = vld [vmem:[%s202_s28 + $0x8] sm:$0xff]  ;;  %s401_s24 = sshll.u32 %s644_s19, 8  ;;  %s230_s26 = scalar_lea.vmem [#allocation7], %s390_s8 }
  0x49   : > { %570 = vsyncadd (%p841_p8), [#allocation6], 4294967040  ;;  %v233_v1 = vld [vmem:[#allocation5] sm:$0xff]  ;;  %v234_v4 = vld [vmem:[#allocation5 + $0x8] sm:$0xff]  ;;  %s299_s29 = sshll.u32 %s230_s26, 4  ;;  %s776_s11 = scalar_lea.hbm %s826_s4, %s401_s24  ;;  %s778_s29 = int_to_ptr.vmem [resolvable:$true] %s299_s29 }
  0x4a   : > { %v235_v3 = vadd.f32 %v233_v1, %v231_v0  ;;  %v236_v5 = vadd.f32 %v234_v4, %v232_v2  ;;  %v393_v25 = vld [vmem:[%s824_s2] ss:$0 sm:$0xff]  ;;  %s286_s19 = scalar_lea.sflag [#allocation4], %s745_s30  ;;  %s521_s20 = scalar_lea.vmem %s778_s29, 256 }
  0x4b   : > { %v394_v27 = vld [vmem:[%s825_s3] ss:$0 sm:$0xff]  ;;  %p522_p3 = scmp.ne.s32.totalorder %s778_s29, %s521_s20  ;;  %p842_p11 = scmp.ne.s32.totalorder %s836_s10, 0 }
  0x4c   : > { %v240_v6 = vsel %vm239_vm0, %v235_v3, 0.0  ;;  %v243_v7 = vsel %vm239_vm0, %v236_v5, 0.0  ;;  %s595_s25 = smov [#allocation7]  }
  0x4d   : > { %241 = vadd.xlane.f32.xlu0 %v240_v6  ;;  %p523_p7 = pnand %p522_p3, %p842_p11  ;;  %s525_s7 = sshll.u32 %s595_s25, 4  ;;  %s526_s7 = int_to_ptr.vmem [resolvable:$false] %s525_s7 }
  0x4e   : > { %s527_s8 = scalar_lea.vmem %s526_s7, 512  ;;  %p528_p10 = scmp.lt.s32.totalorder %s778_s29, %s526_s7 }
  0x4f   : > { %p524_p9 = pneg %p523_p7  ;;  %p529_p12 = scmp.lt.s32.totalorder %s527_s8, %s521_s20 }
  0x51   : > { %244 = vadd.xlane.f32.xlu0 %v243_v7  ;;  %p530_p13 = por %p529_p12, %p528_p10 }
  0x53   : > { %p531_p0 = pnand %p530_p13, %p524_p9 }
  0xd6   : > { %v242_v8 = vpop.xlane.xlu0 %241 }
  0xd7   : > { %v247_v9 = vmul.f32 0.03125, %v242_v8 }
  0xd9   : > { %v249_v10 = vsub.f32 %v235_v3, %v247_v9 }
  0xda   : > { %v245_v11 = vpop.xlane.xlu0 %244 }
  0xdb   : > { %v248_v12 = vmul.f32 0.03125, %v245_v11  ;;  %v251_v13 = vmul.f32 %v249_v10, %v249_v10 }
  0xdd   : > { %v250_v14 = vsub.f32 %v236_v5, %v248_v12  ;;  %v253_v15 = vsel %vm239_vm0, %v251_v13, 0.0 }
  0xde   : > { %254 = vadd.xlane.f32.xlu1 %v253_v15 }
  0xdf   : > { %v252_v16 = vmul.f32 %v250_v14, %v250_v14 }
  0xe1   : > { %v256_v17 = vsel %vm239_vm0, %v252_v16, 0.0 }
  0xe2   : > { %257 = vadd.xlane.f32.xlu1 %v256_v17 }
 0x167   : > { %v255_v18 = vpop.xlane.xlu1 %254 }
 0x168   : > { %v259_v19 = vmul.f32 0.03125, %v255_v18 }
 0x16a   : > { %v261_v20 = vadd.f32 1e-05, %v259_v19 }
 0x16b   : > { %v258_v21 = vpop.xlane.xlu1 %257 }
 0x16c   : > { %463 = vrsqrt.f32 %v261_v20  ;;  %v260_v22 = vmul.f32 0.03125, %v258_v21 }
 0x16e   : > { %v262_v23 = vadd.f32 1e-05, %v260_v22 }
 0x170   : > { %465 = vrsqrt.f32 %v262_v23 }
 0x179   : > { %v464_v24 = vpop.eup %463 }
 0x17a   : > { %v265_v26 = vmul.f32 %v464_v24, %v249_v10 }
 0x17c   : > { %v273_v28 = vmul.f32 %v393_v25, %v265_v26 }
 0x17d   : > { %v466_v29 = vpop.eup %465 }
 0x17e   : > { %v281_v30 = vadd.f32 %v394_v27, %v273_v28  ;;  %v266_v31 = vmul.f32 %v466_v29, %v250_v14 }
 0x180   : > { %v274_v32 = vmul.f32 %v393_v25, %v266_v31  ;;  %283 = vst.msk [vmem:[%s230_s26] sm:$0xff] %vm239_vm0, %v281_v30 }
 0x182   : > { %v282_v33 = vadd.f32 %v394_v27, %v274_v32 }
 0x184   : > { %284 = vst.msk [vmem:[%s230_s26 + $0x8] sm:$0xff] %vm239_vm0, %v282_v33 }
 0x185   : > { %534 = shalt.err (!%p531_p0)
}
 0x186   : > { %s535_s12 = scalar_lea.hbm %s776_s11, 256  ;;  %s539_s23 = scalar_lea.hbm %s826_s4, 512 }
 0x187   : > { %p536_p5 = scmp.ne.s32.totalorder %s776_s11, %s535_s12  ;;  %p540_p4 = scmp.lt.s32.totalorder %s776_s11, %s826_s4 }
 0x188   : > { %p541_p6 = scmp.lt.s32.totalorder %s539_s23, %s535_s12 }
 0x189   : > { %p537_p2 = pnand %p536_p5, %p842_p11 }
 0x18a   : > { %p542_p8 = por %p541_p6, %p540_p4 }
 0x18b   : > { %p538_p1 = pneg %p537_p2 }
 0x18d   : > { %p543_p3 = pnand %p542_p8, %p538_p1 }
 0x18f   : > { %546 = shalt.err (!%p543_p3)
}
 0x190   : > { %s596_s24 = smov 128   ;;  %s597_s26 = smov 8  }
 0x191   : > { %408 = dma.vmem_to_hbm [thread:$0]  (%p842_p11), %s778_s29, 256, %s776_s11, %s286_s19, %s596_s24, %s596_s24, %s597_s26  }
 0x192 PF: > { %s314_s13 = sand.u32 1, %s577_s15   ;;  %p843_p7 = scmp.ne.s32.totalorder %s832_s22, 0 }
 0x193   : > { %p844_p9 = scmp.ge.s32.totalorder %s589_s18, 2  ;;  %s315_s14 = scalar_lea.sflag [#allocation4], %s314_s13 }
 0x195   : > { %p419_p10 = pnand %p844_p9, %p843_p7 }
 0x197   : > { %p420_p12 = pneg %p419_p10 }
 0x199   : > { %572 = dma.done.wait (%p420_p12), %s315_s14, 256  }
 0x19a   : > { %574 = vsyncadd (%p420_p12), %s315_s14, 4294967040  ;;  %p18_p13 = scmp.ge.s32.totalorder %s677_s27, 4   ;;  %s845_s15 = smov %s581_s16 }
 0x19b   : > { %s846_s16 = smov %s585_s17  ;;  %s847_s17 = smov %s697_s9 }
 0x19c   : > { %s848_s18 = smov %s677_s27  ;;  %20 = sbr.rel (!%p18_p13) target bundleno = 6 (0x6), region = 85 }
 0x1a1   :  { %320 = vsyncpa [#allocation3], 1 }
 0x1a2   :  { %322 = vsyncpa [#allocation3 + $0x1], 1 }
 0x1a3   :  { %323 = vsyncpa [#allocation6], 1 }
 0x1a4   :  { %324 = vsyncpa [#allocation4], 1 }
 0x1a5   :  { %326 = vsyncpa [#allocation4 + $0x1], 1 }

</bundles_post_ra>
